<compile_context>
chip_gen: v7x
topology: tpu7x:2x2x1
jax: 0.10.0
libtpu: 0.0.40
codegen_flags: <defaults>
</compile_context>

<pallas_src>
import jax
import jax.numpy as jnp
from jax.experimental import pallas as pl
from jax.experimental.pallas import tpu as pltpu


def _blender_kernel(x_ref, data_ref, out_ref):
    # x_ref   : (S, TR, 128)      parameter tile (channel-1 axis squeezed out)
    # data_ref: (S, C, TR, 128)   data tile
    # out_ref : (C, TR, 128)      output tile
    x = x_ref[...].astype(jnp.float32)                        # (S, TR, 128)

    # Numerically stable softmax pieces over the profile axis (axis 0).
    m = jnp.max(x, axis=0, keepdims=True)                     # (1, TR, 128)
    e = jnp.exp(x - m)                                        # (S, TR, 128)
    denom = jnp.sum(e, axis=0)                                # (TR, 128)

    d = data_ref[...]                                         # (S, C, TR, 128)
    if d.dtype == jnp.bfloat16:
        # Multiply in bf16 (native VPU on v6e/v7x), accumulate in f32.
        prod = e.astype(jnp.bfloat16)[:, None, :, :] * d
    else:
        prod = e[:, None, :, :] * d.astype(jnp.float32)
    acc = jnp.sum(prod, axis=0, dtype=jnp.float32)            # (C, TR, 128)

    # Normalize after the reduction: C*TN multiplies instead of S*TN.
    inv = pl.reciprocal(denom, approx=True)                   # EUP slot
    out = acc * inv[None, :, :]
    out_ref[...] = out.astype(out_ref.dtype)


def _plan_rows(N, S, C, itemsize, vmem_budget_bytes=16 << 20):
    """Return (rows, tile_rows): padded row count (N -> rows*128 lanes) and a
    row-tile that (a) fits a double-buffered VMEM budget, (b) is a multiple
    of 8 whenever it is smaller than the full extent, and (c) keeps >= 2 grid
    steps when that is free (v7x megacore sharding)."""
    bytes_per_row = 2 * (S * C + S + C) * 128 * itemsize      # 2x = double-buffer
    max_rows = max(8, int(vmem_budget_bytes // bytes_per_row))

    rows128 = -(-N // 128)                                    # ceil(N / 128)

    if rows128 <= max_rows:
        # Whole thing fits in one block.  Split in two if it is cheap, so the
        # "parallel" grid axis can be sharded across two TensorCores.
        if rows128 % 16 == 0 and rows128 >= 16:
            return rows128, rows128 // 2
        return rows128, rows128

    # Needs tiling: pad rows to a multiple of 8 so every tile is sublane-dense,
    # then pick the largest multiple-of-8 divisor within budget.
    rows = -(-rows128 // 8) * 8
    limit = (max_rows // 8) * 8
    tile_rows = 8                                             # always divides rows
    for t in range(limit, 7, -8):
        if rows % t == 0:
            tile_rows = t
            break
    return rows, tile_rows


def blender_profiles_times_rho(x_param, data):
    """x_param: (S, 1, D1, D2, D3), data: (S, C, D1, D2, D3) -> (C, D1, D2, D3)."""
    S, C, D1, D2, D3 = data.shape
    assert x_param.shape == (S, 1, D1, D2, D3)
    N = D1 * D2 * D3

    itemsize = max(jnp.dtype(data.dtype).itemsize, jnp.dtype(x_param.dtype).itemsize)
    rows, tile_rows = _plan_rows(N, S, C, itemsize)
    assert rows % tile_rows == 0
    grid = (rows // tile_rows,)

    # Flatten spatial dims; zero-pad up to rows*128 lanes if needed.
    x_flat = x_param.reshape(S, N)
    data_flat = data.reshape(S, C, N)
    N_pad = rows * 128
    if N_pad != N:
        pad = N_pad - N
        x_flat = jnp.pad(x_flat, ((0, 0), (0, pad)))
        data_flat = jnp.pad(data_flat, ((0, 0), (0, 0), (0, pad)))
    x_flat = x_flat.reshape(S, rows, 128)
    data_flat = data_flat.reshape(S, C, rows, 128)

    cost = pl.CostEstimate(
        flops=3 * S * C * N_pad,
        transcendentals=S * N_pad,
        bytes_accessed=(S * C * N_pad + C * N_pad) * jnp.dtype(data.dtype).itemsize
        + S * N_pad * jnp.dtype(x_param.dtype).itemsize,
    )

    out_flat = pl.pallas_call(
        _blender_kernel,
        out_shape=jax.ShapeDtypeStruct((C, rows, 128), data.dtype),
        grid_spec=pltpu.PrefetchScalarGridSpec(
            num_scalar_prefetch=0,
            grid=grid,
            in_specs=[
                pl.BlockSpec((S, tile_rows, 128), lambda j: (0, j, 0)),
                pl.BlockSpec((S, C, tile_rows, 128), lambda j: (0, 0, j, 0)),
            ],
            out_specs=pl.BlockSpec((C, tile_rows, 128), lambda j: (0, j, 0)),
        ),
        compiler_params=pltpu.CompilerParams(
            dimension_semantics=("parallel",),
        ),
        cost_estimate=cost,
    )(x_flat, data_flat)

    out = out_flat.reshape(C, N_pad)
    if N_pad != N:
        out = out[:, :N]
    return out.reshape(C, D1, D2, D3)


if __name__ == "__main__":
    # Small shapes: S=4 profiles, C=3 channels, spatial (2, 8, 16) -> N=256.
    S, C, D1, D2, D3 = 4, 3, 2, 8, 16
    input_shape = (S, C, D1, D2, D3)

    # Parameter initialized exactly as in the module's __init__ (ones).
    x_param = jnp.ones((S, 1, D1, D2, D3), dtype=jnp.float32)

    key = jax.random.PRNGKey(0)
    data = jax.random.normal(key, input_shape, dtype=jnp.float32)

    out = blender_profiles_times_rho(x_param, data)
    out = jax.block_until_ready(out)

    # Pure-JAX reference for correctness.
    coeff = jax.nn.softmax(x_param, axis=0)          # (S, 1, D1, D2, D3)
    ref = jnp.sum(coeff * data, axis=0)              # (C, D1, D2, D3)
    assert out.shape == (C, D1, D2, D3)
    assert jnp.allclose(out, ref, atol=1e-4, rtol=1e-4)

    print("KERNEL_OK")
</pallas_src>

<mosaic_0001>
module attributes {stable_mosaic.version = 11 : i64} {
  func.func @_blender_kernel(%arg0: i32, %arg1: memref<4x2x128xf32, #tpu.memory_space<vmem>>, %arg2: memref<4x3x2x128xf32, #tpu.memory_space<vmem>>, %arg3: memref<3x2x128xf32, #tpu.memory_space<vmem>>) attributes {dimension_semantics = [#tpu.dimension_semantics<parallel>], iteration_bounds = array<i64: 1>, scalar_prefetch = 0 : i64, scratch_operands = 0 : i64, tpu.core_type = #tpu.core_type<tc>, window_params = [{transform_indices = @transform_0, window_bounds = array<i64: 4, 2, 128>}, {transform_indices = @transform_1, window_bounds = array<i64: 4, 3, 2, 128>}, {transform_indices = @transform_2, window_bounds = array<i64: 3, 2, 128>}]} {
    %c0 = arith.constant 0 : index
    %c0_0 = arith.constant 0 : index
    %c0_1 = arith.constant 0 : index
    %0 = vector.load %arg1[%c0, %c0_0, %c0_1] : memref<4x2x128xf32, #tpu.memory_space<vmem>>, vector<4x2x128xf32>
    %cst = arith.constant dense<0xFF800000> : vector<2x128xf32>
    %1 = vector.multi_reduction <maximumf>, %0, %cst [0] : vector<4x2x128xf32> to vector<2x128xf32>
    %2 = vector.shape_cast %1 : vector<2x128xf32> to vector<1x2x128xf32>
    %3 = vector.broadcast %2 : vector<1x2x128xf32> to vector<4x2x128xf32>
    %4 = arith.subf %0, %3 : vector<4x2x128xf32>
    %5 = math.exp %4 : vector<4x2x128xf32>
    %cst_2 = arith.constant dense<0.000000e+00> : vector<2x128xf32>
    %6 = vector.multi_reduction <add>, %5, %cst_2 [0] : vector<4x2x128xf32> to vector<2x128xf32>
    %c0_3 = arith.constant 0 : index
    %c0_4 = arith.constant 0 : index
    %c0_5 = arith.constant 0 : index
    %c0_6 = arith.constant 0 : index
    %7 = vector.load %arg2[%c0_3, %c0_4, %c0_5, %c0_6] : memref<4x3x2x128xf32, #tpu.memory_space<vmem>>, vector<4x3x2x128xf32>
    %8 = vector.shape_cast %5 : vector<4x2x128xf32> to vector<4x1x2x128xf32>
    %9 = vector.broadcast %8 : vector<4x1x2x128xf32> to vector<4x3x2x128xf32>
    %10 = arith.mulf %9, %7 : vector<4x3x2x128xf32>
    %cst_7 = arith.constant dense<0.000000e+00> : vector<3x2x128xf32>
    %11 = vector.multi_reduction <add>, %10, %cst_7 [0] : vector<4x3x2x128xf32> to vector<3x2x128xf32>
    %12 = tpu.reciprocal %6 {approx = true} : vector<2x128xf32> -> vector<2x128xf32>
    %13 = vector.shape_cast %12 : vector<2x128xf32> to vector<1x2x128xf32>
    %14 = vector.broadcast %13 : vector<1x2x128xf32> to vector<3x2x128xf32>
    %15 = arith.mulf %11, %14 : vector<3x2x128xf32>
    %c0_8 = arith.constant 0 : index
    %c0_9 = arith.constant 0 : index
    %c0_10 = arith.constant 0 : index
    %16 = vector.load %arg3[%c0_8, %c0_9, %c0_10] : memref<3x2x128xf32, #tpu.memory_space<vmem>>, vector<3x2x128xf32>
    tpu.vector_store %arg3[%c0_8, %c0_9, %c0_10], %15 {strides = array<i32>} : memref<3x2x128xf32, #tpu.memory_space<vmem>>, vector<3x2x128xf32>,
    return
  }
  func.func @transform_0(%arg0: i32) -> (i32, i32, i32) {
    %c0_i32 = arith.constant 0 : i32
    %c0_i32_0 = arith.constant 0 : i32
    %c0_i32_1 = arith.constant 0 : i32
    return %c0_i32, %arg0, %c0_i32_0 : i32, i32, i32
  }
  func.func @transform_1(%arg0: i32) -> (i32, i32, i32, i32) {
    %c0_i32 = arith.constant 0 : i32
    %c0_i32_0 = arith.constant 0 : i32
    %c0_i32_1 = arith.constant 0 : i32
    %c0_i32_2 = arith.constant 0 : i32
    return %c0_i32, %c0_i32_0, %arg0, %c0_i32_1 : i32, i32, i32, i32
  }
  func.func @transform_2(%arg0: i32) -> (i32, i32, i32) {
    %c0_i32 = arith.constant 0 : i32
    %c0_i32_0 = arith.constant 0 : i32
    %c0_i32_1 = arith.constant 0 : i32
    return %c0_i32, %arg0, %c0_i32_0 : i32, i32, i32
  }
}

</mosaic_0001>

<bundles_post_ra>
// kernel: tpu_custom_call.1
= control target key start
LH: loop header
LB: loop body
LE: loop exit
PB: predicated region body
PF: predicated region fallthrough
CT: control target
= control target key end

     0   :  { %7 = vsyncpa [#allocation3], 0  ;;  %s313_s0 = inlined_call_operand.hbm [shape: f32[4,2,128], index: 0, kind: input, shape index: {}]   ;;  %s314_s1 = inlined_call_operand.hbm [shape: f32[4,3,2,128], index: 1, kind: input, shape index: {}]   ;;  %s315_s2 = inlined_call_operand.hbm [shape: f32[3,2,128], index: 2, kind: output, shape index: {}]  }
   0x1   :  { %8 = vsyncpa [#allocation6], 0 }
   0x2   :  { %9 = vsyncpa [#allocation4], 0  ;;  %s228_s9 = smov [#allocation2]   ;;  %s156_s13 = scalar_lea.hbm %s313_s0, 128 }
   0x3   :  { %s15_s10 = sshll.u32 %s228_s9, 4  ;;  %p157_p0 = scmp.ne.s32.totalorder %s313_s0, %s156_s13  ;;  %s16_s10 = int_to_ptr.vmem [resolvable:$true] %s15_s10 }
   0x4   :  { %p160_p1 = scmp.lt.u32.totalorder %s156_s13, %s313_s0 }
   0x6   :  { %p162_p2 = pnand %p160_p1, %p157_p0 }
   0x8   :  { %165 = shalt.err (!%p162_p2)
}
   0x9   :  { %s166_s18 = scalar_lea.vmem %s16_s10, 128  ;;  %p171_p4 = scmp.lt.s32.totalorder %s16_s10, %s16_s10 }
   0xa   :  { %p167_p3 = scmp.ne.s32.totalorder %s16_s10, %s166_s18  ;;  %p172_p5 = scmp.lt.s32.totalorder %s166_s18, %s166_s18 }
   0xc   :  { %p173_p6 = por %p172_p5, %p171_p4 }
   0xe   :  { %p174_p7 = pnand %p173_p6, %p167_p3 }
  0x10   :  { %177 = shalt.err (!%p174_p7)
}
  0x11   :  { %s229_s19 = smov 32   ;;  %s230_s20 = smov 2  }
  0x12   :  { %21 = dma.hbm_to_vmem [thread:$0]  %s313_s0, 128, %s16_s10, [#allocation3], %s229_s19, %s229_s19, %s230_s20  }
  0x13   :  { %s231_s23 = smov [#allocation5]   ;;  %s178_s27 = scalar_lea.hbm %s314_s1, 384 }
  0x14   :  { %s27_s24 = sshll.u32 %s231_s23, 4  ;;  %p179_p8 = scmp.ne.s32.totalorder %s314_s1, %s178_s27  ;;  %s28_s24 = int_to_ptr.vmem [resolvable:$true] %s27_s24 }
  0x15   :  { %p182_p9 = scmp.lt.u32.totalorder %s178_s27, %s314_s1 }
  0x17   :  { %p184_p10 = pnand %p182_p9, %p179_p8 }
  0x19   :  { %187 = shalt.err (!%p184_p10)
}
  0x1a   :  { %s188_s4 = scalar_lea.vmem %s28_s24, 384  ;;  %p193_p12 = scmp.lt.s32.totalorder %s28_s24, %s28_s24 }
  0x1b   :  { %p189_p11 = scmp.ne.s32.totalorder %s28_s24, %s188_s4  ;;  %p194_p13 = scmp.lt.s32.totalorder %s188_s4, %s188_s4 }
  0x1d   :  { %p195_p0 = por %p194_p13, %p193_p12 }
  0x1f   :  { %p196_p1 = pnand %p195_p0, %p189_p11 }
  0x21   :  { %199 = shalt.err (!%p196_p1)
}
  0x22   :  { %33 = dma.hbm_to_vmem [thread:$0]  %s314_s1, 384, %s28_s24, [#allocation6], %s229_s19, %s229_s19, %s230_s20  }
  0x23   :  { %222 = dma.done.wait [#allocation3], 128  }
  0x24   :  { %223 = vsyncadd [#allocation3], 4294967168 }
  0x25   :  { %224 = dma.done.wait [#allocation6], 384  }
  0x26   :  { %225 = vsyncadd [#allocation6], 4294966912  ;;  %vm44_vm0 = vcmask 1041408   ;;  %v40_v0 = vld [vmem:[#allocation2] sm:$0x3]  ;;  %s232_s1 = smov [#allocation7]  }
  0x27   :  { %v41_v1 = vld [vmem:[#allocation2 + $0x2] sm:$0x3]  ;;  %v42_v2 = vld [vmem:[#allocation2 + $0x4] sm:$0x3]  ;;  %v43_v3 = vld [vmem:[#allocation2 + $0x6] sm:$0x3] }
  0x28   :  { %v45_v4 = vsel %vm44_vm0, %v40_v0, -inf  ;;  %v46_v5 = vsel %vm44_vm0, %v41_v1, -inf  ;;  %v47_v6 = vsel %vm44_vm0, %v42_v2, -inf  ;;  %v48_v7 = vsel %vm44_vm0, %v43_v3, -inf  ;;  %v71_v19 = vld [vmem:[#allocation5] sm:$0x3] }
  0x29   :  { %v49_v8 = vmax.f32 %v45_v4, %v46_v5  ;;  %v50_v9 = vmax.f32 %v47_v6, %v48_v7  ;;  %v74_v20 = vld [vmem:[#allocation5 + $0x6] sm:$0x3]  ;;  %v72_v21 = vld [vmem:[#allocation5 + $0x2] sm:$0x3]  ;;  %v75_v22 = vld [vmem:[#allocation5 + $0x8] sm:$0x3] }
  0x2a   :  { %v77_v24 = vld [vmem:[#allocation5 + $0xc] sm:$0x3]  ;;  %v73_v25 = vld [vmem:[#allocation5 + $0x4] sm:$0x3]  ;;  %v76_v29 = vld [vmem:[#allocation5 + $0xa] sm:$0x3] }
  0x2b   :  { %v51_v10 = vmax.f32 %v49_v8, %v50_v9  ;;  %v78_v33 = vld [vmem:[#allocation5 + $0xe] sm:$0x3]  ;;  %v80_v39 = vld [vmem:[#allocation5 + $0x12] sm:$0x3]  ;;  %v81_v45 = vld [vmem:[#allocation5 + $0x14] sm:$0x3] }
  0x2c   :  { %v79_v49 = vld [vmem:[#allocation5 + $0x10] sm:$0x3]  ;;  %v82_v53 = vld [vmem:[#allocation5 + $0x16] sm:$0x3]  ;;  %s128_s6 = sshll.u32 %s232_s1, 4  ;;  %s129_s6 = int_to_ptr.vmem [resolvable:$true] %s128_s6 }
  0x2d   :  { %v52_v11 = vsub.f32 %v40_v0, %v51_v10  ;;  %v53_v12 = vsub.f32 %v41_v1, %v51_v10  ;;  %v54_v13 = vsub.f32 %v42_v2, %v51_v10  ;;  %v55_v14 = vsub.f32 %v43_v3, %v51_v10  ;;  %s200_s7 = scalar_lea.vmem %s129_s6, 96  ;;  %p205_p3 = scmp.lt.s32.totalorder %s129_s6, %s129_s6 }
  0x2e   :  { %p201_p2 = scmp.ne.s32.totalorder %s129_s6, %s200_s7  ;;  %p206_p4 = scmp.lt.s32.totalorder %s200_s7, %s200_s7 }
  0x2f   :  { %v56_v15 = vmul.f32 1.442695, %v52_v11  ;;  %v58_v16 = vmul.f32 1.442695, %v53_v12  ;;  %v60_v17 = vmul.f32 1.442695, %v54_v13 }
  0x30   :  { %v62_v18 = vmul.f32 1.442695, %v55_v14  ;;  %p207_p5 = por %p206_p4, %p205_p3 }
  0x31   :  { %146 = vpow2.f32 %v56_v15 }
  0x32   :  { %148 = vpow2.f32 %v58_v16  ;;  %p208_p6 = pnand %p207_p5, %p201_p2 }
  0x33   :  { %150 = vpow2.f32 %v60_v17 }
  0x34   :  { %152 = vpow2.f32 %v62_v18 }
  0x3b   :  { %v147_v23 = vpop.eup %146 }
  0x3c   :  { %v149_v26 = vpop.eup %148  ;;  %v64_v27 = vsel %vm44_vm0, %v147_v23, 0.0  ;;  %v83_v28 = vmul.f32 %v147_v23, %v71_v19  ;;  %v84_v34 = vmul.f32 %v147_v23, %v72_v21  ;;  %v85_v41 = vmul.f32 %v147_v23, %v73_v25 }
  0x3d   :  { %v151_v30 = vpop.eup %150  ;;  %v65_v31 = vsel %vm44_vm0, %v149_v26, 0.0  ;;  %v86_v32 = vmul.f32 %v149_v26, %v74_v20  ;;  %v87_v35 = vmul.f32 %v149_v26, %v75_v22  ;;  %v88_v46 = vmul.f32 %v149_v26, %v76_v29 }
  0x3e   :  { %v153_v36 = vpop.eup %152  ;;  %v66_v37 = vadd.f32 %v65_v31, %v64_v27  ;;  %v67_v38 = vsel %vm44_vm0, %v151_v30, 0.0  ;;  %v89_v40 = vmul.f32 %v151_v30, %v77_v24  ;;  %v95_v43 = vsel %vm44_vm0, %v83_v28, 0.0 }
  0x3f   :  { %v69_v42 = vsel %vm44_vm0, %v153_v36, 0.0  ;;  %v96_v44 = vsel %vm44_vm0, %v86_v32, 0.0  ;;  %v90_v48 = vmul.f32 %v151_v30, %v78_v33  ;;  %v92_v50 = vmul.f32 %v153_v36, %v80_v39 }
  0x40   :  { %v68_v47 = vadd.f32 %v67_v38, %v66_v37  ;;  %v102_v51 = vsel %vm44_vm0, %v84_v34, 0.0  ;;  %v103_v52 = vsel %vm44_vm0, %v87_v35, 0.0  ;;  %v97_v55 = vadd.f32 %v96_v44, %v95_v43 }
  0x41   :  { %v98_v56 = vsel %vm44_vm0, %v89_v40, 0.0  ;;  %v93_v57 = vmul.f32 %v153_v36, %v81_v45  ;;  %v104_v58 = vadd.f32 %v103_v52, %v102_v51  ;;  %v91_v59 = vmul.f32 %v151_v30, %v79_v49 }
  0x42   :  { %v70_v54 = vadd.f32 %v69_v42, %v68_v47  ;;  %v109_v60 = vsel %vm44_vm0, %v85_v41, 0.0  ;;  %v110_v61 = vsel %vm44_vm0, %v88_v46, 0.0  ;;  %v105_v62 = vsel %vm44_vm0, %v90_v48, 0.0 }
  0x43   :  { %v94_v63 = vmul.f32 %v153_v36, %v82_v53  ;;  %v111_v0 = vadd.f32 %v110_v61, %v109_v60  ;;  %v112_v1 = vsel %vm44_vm0, %v91_v59, 0.0  ;;  %v99_v2 = vadd.f32 %v98_v56, %v97_v55 }
  0x44   :  { %154 = vrcp.f32 %v70_v54  ;;  %v106_v3 = vadd.f32 %v105_v62, %v104_v58  ;;  %v100_v5 = vsel %vm44_vm0, %v92_v50, 0.0  ;;  %v107_v6 = vsel %vm44_vm0, %v93_v57, 0.0 }
  0x45   :  { %v113_v4 = vadd.f32 %v112_v1, %v111_v0  ;;  %v114_v7 = vsel %vm44_vm0, %v94_v63, 0.0  ;;  %v101_v8 = vadd.f32 %v100_v5, %v99_v2 }
  0x46   :  { %v108_v9 = vadd.f32 %v107_v6, %v106_v3 }
  0x47   :  { %v115_v10 = vadd.f32 %v114_v7, %v113_v4 }
  0x4e   :  { %v155_v11 = vpop.eup %154 }
  0x4f   :  { %v117_v12 = vmul.f32 %v155_v11, %v101_v8  ;;  %v118_v13 = vmul.f32 %v155_v11, %v108_v9  ;;  %v119_v14 = vmul.f32 %v155_v11, %v115_v10 }
  0x51   :  { %120 = vst [vmem:[#allocation7] sm:$0x3] %v117_v12  ;;  %121 = vst [vmem:[#allocation7 + $0x2] sm:$0x3] %v118_v13 }
  0x52   :  { %122 = vst [vmem:[#allocation7 + $0x4] sm:$0x3] %v119_v14 }
  0x53   :  { %211 = shalt.err (!%p208_p6)
}
  0x54   :  { %s212_s10 = scalar_lea.hbm %s315_s2, 96 }
  0x55   :  { %p213_p7 = scmp.ne.s32.totalorder %s315_s2, %s212_s10  ;;  %p216_p8 = scmp.lt.u32.totalorder %s212_s10, %s315_s2 }
  0x57   :  { %p218_p9 = pnand %p216_p8, %p213_p7 }
  0x59   :  { %221 = shalt.err (!%p218_p9)
}
  0x5a   :  { %134 = dma.vmem_to_hbm [thread:$0]  %s129_s6, 96, %s315_s2, [#allocation4], %s229_s19, %s229_s19, %s230_s20  }
  0x5b   :  { %226 = dma.done.wait [#allocation4], 96  }
  0x5c   :  { %227 = vsyncadd [#allocation4], 4294967200 }
  0x5d   :  { %138 = vsyncpa [#allocation3], 1 }
  0x5e   :  { %139 = vsyncpa [#allocation6], 1 }
  0x5f   :  { %140 = vsyncpa [#allocation4], 1 }

</bundles_post_ra>
